<compile_context>
chip_gen: v7x
topology: tpu7x:2x2x1
jax: 0.10.0
libtpu: 0.0.40
codegen_flags: <defaults>
</compile_context>

<pallas_src>
import functools

import jax
import jax.numpy as jnp
from jax.experimental import pallas as pl
from jax.experimental.pallas import tpu as pltpu


OUT_PAD = 128  # lane-dense padded width for the final fc output

# Row layout of the packed small-parameter slab (f32, width = max(E, OUT_PAD)).
_ROW_BBB = 0    # backbone bias                       (E,)
_ROW_WVIT = 1   # vit weight, channel-summed          (E,)
_ROW_BVIT = 2   # vit bias                            (E,)
_ROW_BQ = 3     # q bias (pre-scaled by 1/sqrt(D))    (E,)
_ROW_BK = 4     # k bias                              (E,)
_ROW_BV = 5     # v bias                              (E,)
_ROW_BOF = 6    # fused out_proj∘fc bias              (OUT_PAD,)
_ROW_WBB = 7    # backbone weight rows (C of them)    (C, E)


# ----------------------------------------------------------------------------
# Fused kernel: backbone(image) + backbone(mask) + MultiheadAttention + fc.
# ----------------------------------------------------------------------------
def _coeff_gen_kernel(num_heads, img_ref, msk_ref, wq_ref, wkv_ref, wof_ref,
                      sp_ref, o_ref):
    f32, bf16 = jnp.float32, jnp.bfloat16
    C, B, HW = img_ref.shape
    E = wq_ref.shape[0]
    OUTP = wof_ref.shape[1]
    H = num_heads
    D = E // H
    L = B   # nn.MultiheadAttention gets unbatched (L, E) inputs: batch acts as seq len

    # GAP weight: ones/(H*W) column; bf16 operands, f32 MXU accumulation.
    inv_hw = jnp.full((HW, 1), 1.0 / HW, dtype=bf16)

    # ---- backbone stand-in (mask): GAP on MXU; the channel replication from
    #      mask.expand_as(image) is folded into the channel-summed vit weight. ----
    msk_gap = jnp.dot(msk_ref[...], inv_hw, preferred_element_type=f32)          # (B, 1)
    msk_feat = (msk_gap * sp_ref[_ROW_WVIT:_ROW_WVIT + 1, :E]
                + sp_ref[_ROW_BVIT:_ROW_BVIT + 1, :E])                           # (B, E) f32

    # ---- backbone stand-in (image): per-channel GAP on MXU + rank-1 channel mix
    #      on the VPU (C == 3, static unroll; all VPU math stays f32). ----
    img_feat = sp_ref[_ROW_BBB:_ROW_BBB + 1, :E]                                 # (1, E) -> bcast
    for c in range(C):
        gap_c = jnp.dot(img_ref[c], inv_hw, preferred_element_type=f32)          # (B, 1)
        img_feat = img_feat + gap_c * sp_ref[_ROW_WBB + c:_ROW_WBB + c + 1, :E]  # (B, E)

    # ---- nn.MultiheadAttention(E, H): q = image feats, k = v = mask feats ----
    # Full-width packed projections; 1/sqrt(D) is already folded into wq / bq.
    qf = jnp.dot(img_feat.astype(bf16), wq_ref[...],
                 preferred_element_type=f32) + sp_ref[_ROW_BQ:_ROW_BQ + 1, :E]   # (L, E)
    kvf = jnp.dot(msk_feat.astype(bf16), wkv_ref[...],
                  preferred_element_type=f32)                                    # (L, 2E)
    kf = kvf[:, :E] + sp_ref[_ROW_BK:_ROW_BK + 1, :E]                            # (L, E)
    vf = kvf[:, E:] + sp_ref[_ROW_BV:_ROW_BV + 1, :E]                            # (L, E)

    # Head split is a pure layout op (PyTorch head order: contiguous D-chunks).
    Qh = qf.astype(bf16).reshape(L, H, D)
    Kh = kf.astype(bf16).reshape(L, H, D)
    Vh = vf.astype(bf16).reshape(L, H, D)

    # Scaled-dot-product attention; softmax in f32, reciprocal on the EUP.
    s = jnp.einsum('lhd,shd->hls', Qh, Kh, preferred_element_type=f32)           # (H, L, S)
    s = s - jnp.max(s, axis=-1, keepdims=True)
    p = jnp.exp(s)
    p = p * pl.reciprocal(jnp.sum(p, axis=-1, keepdims=True), approx=True)

    ctx = jnp.einsum('hls,shd->hld', p.astype(bf16), Vh,
                     preferred_element_type=f32)                                 # (H, L, D)
    ctx_flat = jnp.transpose(ctx, (1, 0, 2)).reshape(L, E)                       # (L, E)

    # Fused out_proj∘fc: single (L, E) @ (E, OUT_PAD) matmul; head sum is done by
    # the MXU contraction. Lane-dense 128-wide output, sliced outside the kernel.
    o_ref[...] = (jnp.dot(ctx_flat.astype(bf16), wof_ref[...],
                          preferred_element_type=f32)
                  + sp_ref[_ROW_BOF:_ROW_BOF + 1, :OUTP])


def _full_spec(shape):
    zeros = (0,) * len(shape)
    return pl.BlockSpec(tuple(shape), lambda i, _z=zeros: _z)


# ----------------------------------------------------------------------------
# Parameters: PyTorch-layout masters converted ONCE to kernel-ready layouts.
# ----------------------------------------------------------------------------
def init_params(key, embed_dim=32, num_output=6, in_ch=3, num_heads=8):
    assert embed_dim % num_heads == 0
    E, H = embed_dim, num_heads
    D = E // H
    scale = 1.0 / (D ** 0.5)
    ks = jax.random.split(key, 8)
    s = 0.02
    f32, bf16 = jnp.float32, jnp.bfloat16

    # PyTorch-layout master weights (shapes follow the module __init__)
    backbone_w = jax.random.normal(ks[0], (in_ch, E), f32) * s
    backbone_b = jax.random.normal(ks[1], (E,), f32) * s
    vit_w = jax.random.normal(ks[2], (in_ch, E), f32) * s
    vit_b = jax.random.normal(ks[3], (E,), f32) * s
    in_proj_w = jax.random.normal(ks[4], (3 * E, E), f32) * s    # rows q|k|v, x @ W.T
    in_proj_b = jax.random.normal(ks[5], (3 * E,), f32) * s
    out_proj_w = jax.random.normal(ks[6], (E, E), f32) * s       # x @ W.T
    out_proj_b = jnp.zeros((E,), f32)
    fc_w = jax.random.normal(ks[7], (num_output, E), f32) * s    # x @ W.T
    fc_b = jnp.zeros((num_output,), f32)

    # ---- one-time conversion to kernel-ready layouts ----
    # 1/sqrt(D) attention scale folded into the q projection.
    wq = in_proj_w[:E].T * scale                                  # (E, E)
    bq = in_proj_b[:E] * scale
    # K and V packed into a single (E, 2E) slab -> one matmul, one DMA.
    wkv = jnp.concatenate([in_proj_w[E:2 * E].T, in_proj_w[2 * E:].T], axis=1)
    bk = in_proj_b[E:2 * E]
    bv = in_proj_b[2 * E:]
    # Exact algebraic fusion of out_proj followed by fc (both plain Linear layers),
    # precomputed in f32 and padded to a lane-dense 128-wide output:
    #   fc(out_proj(x)) = x @ (Wo^T Wfc^T) + (bo Wfc^T + bfc)
    wfc_t = jnp.zeros((E, OUT_PAD), f32).at[:, :num_output].set(fc_w.T)
    bfc_p = jnp.zeros((OUT_PAD,), f32).at[:num_output].set(fc_b)
    wof = out_proj_w.T @ wfc_t                                    # (E, OUT_PAD)
    bof = out_proj_b @ wfc_t + bfc_p                              # (OUT_PAD,)

    # All small / 1-D parameters packed into ONE f32 slab (single DMA).
    W = max(E, OUT_PAD)
    small = jnp.zeros((_ROW_WBB + in_ch, W), f32)
    small = small.at[_ROW_BBB, :E].set(backbone_b)
    small = small.at[_ROW_WVIT, :E].set(vit_w.sum(axis=0))        # mask-channel fold
    small = small.at[_ROW_BVIT, :E].set(vit_b)
    small = small.at[_ROW_BQ, :E].set(bq)
    small = small.at[_ROW_BK, :E].set(bk)
    small = small.at[_ROW_BV, :E].set(bv)
    small = small.at[_ROW_BOF, :OUT_PAD].set(bof)
    small = small.at[_ROW_WBB:_ROW_WBB + in_ch, :E].set(backbone_w)

    return dict(
        num_output=num_output, num_heads=H,
        wq=wq.astype(bf16),            # (E, E)    bf16, scale folded
        wkv=wkv.astype(bf16),          # (E, 2E)   bf16
        wof=wof.astype(bf16),          # (E, 128)  bf16, out_proj∘fc fused
        small=small,                   # (7+C, max(E,128)) f32
    )


# ----------------------------------------------------------------------------
# Forward pass (mirrors CoefficientGenerator.forward) — single pallas_call.
# ----------------------------------------------------------------------------
def coefficient_generator_forward(params, image_list, mask_list):
    image = jnp.stack(image_list)              # torch.stack(image) -> (B, 3, H, W)
    mask = jnp.stack(mask_list)                # torch.stack(mask)  -> (B, 1, H, W)
    B, C, Hh, Ww = image.shape
    HW = Hh * Ww

    # bf16 in HBM halves the only large read; accumulation stays f32 on the MXU.
    img = image.reshape(B, C, HW).transpose(1, 0, 2).astype(jnp.bfloat16)  # (C, B, HW)
    msk = mask.reshape(B, HW).astype(jnp.bfloat16)                         # (B, HW)

    args = (img, msk, params["wq"], params["wkv"], params["wof"], params["small"])
    in_specs = [_full_spec(a.shape) for a in args]

    kernel = functools.partial(_coeff_gen_kernel, params["num_heads"])
    out_pad = pl.pallas_call(
        kernel,
        grid=(1,),
        in_specs=in_specs,
        out_specs=_full_spec((B, OUT_PAD)),
        out_shape=jax.ShapeDtypeStruct((B, OUT_PAD), jnp.float32),
        compiler_params=pltpu.CompilerParams(
            dimension_semantics=("arbitrary",)),
    )(*args)

    return out_pad[:, :params["num_output"]]


if __name__ == "__main__":
    key = jax.random.PRNGKey(0)
    pkey, ikey, mkey = jax.random.split(key, 3)

    B, C, H, W = 2, 3, 16, 16
    E = 32            # small stand-in for resnet101's fc_in_features (=2048)
    NUM_OUTPUT = 6
    NUM_HEADS = 8     # must divide E (2048 % 8 == 0 in the original too)

    params = init_params(pkey, embed_dim=E, num_output=NUM_OUTPUT,
                         in_ch=C, num_heads=NUM_HEADS)
    image_list = [
        jax.random.normal(jax.random.fold_in(ikey, b), (C, H, W), jnp.float32)
        for b in range(B)
    ]
    mask_list = [
        jax.random.uniform(jax.random.fold_in(mkey, b), (1, H, W), jnp.float32)
        for b in range(B)
    ]

    out = coefficient_generator_forward(params, image_list, mask_list)
    out = jax.block_until_ready(out)
    assert out.shape == (B, NUM_OUTPUT)
    assert bool(jnp.isfinite(out).all())
    _ = out.tolist()  # matches `return output.tolist()` (host-side conversion)
    print("KERNEL_OK")
</pallas_src>

<mosaic_0001>
module attributes {stable_mosaic.version = 11 : i64} {
  func.func @_coeff_gen_kernel(%arg0: i32, %arg1: memref<3x2x256xbf16, #tpu.memory_space<vmem>>, %arg2: memref<2x256xbf16, #tpu.memory_space<vmem>>, %arg3: memref<32x32xbf16, #tpu.memory_space<vmem>>, %arg4: memref<32x64xbf16, #tpu.memory_space<vmem>>, %arg5: memref<32x128xbf16, #tpu.memory_space<vmem>>, %arg6: memref<10x128xf32, #tpu.memory_space<vmem>>, %arg7: memref<2x128xf32, #tpu.memory_space<vmem>>) attributes {dimension_semantics = [#tpu.dimension_semantics<arbitrary>], iteration_bounds = array<i64: 1>, scalar_prefetch = 0 : i64, scratch_operands = 0 : i64, tpu.core_type = #tpu.core_type<tc>, window_params = [{pipeline_mode = #tpu.pipeline_mode<synchronous>, transform_indices = @transform_0, window_bounds = array<i64: 3, 2, 256>}, {pipeline_mode = #tpu.pipeline_mode<synchronous>, transform_indices = @transform_1, window_bounds = array<i64: 2, 256>}, {pipeline_mode = #tpu.pipeline_mode<synchronous>, transform_indices = @transform_2, window_bounds = array<i64: 32, 32>}, {pipeline_mode = #tpu.pipeline_mode<synchronous>, transform_indices = @transform_3, window_bounds = array<i64: 32, 64>}, {pipeline_mode = #tpu.pipeline_mode<synchronous>, transform_indices = @transform_4, window_bounds = array<i64: 32, 128>}, {pipeline_mode = #tpu.pipeline_mode<synchronous>, transform_indices = @transform_5, window_bounds = array<i64: 10, 128>}, {pipeline_mode = #tpu.pipeline_mode<synchronous>, transform_indices = @transform_6, window_bounds = array<i64: 2, 128>}]} {
    %cst = arith.constant 3.906250e-03 : bf16
    %0 = vector.broadcast %cst : bf16 to vector<256x1xbf16>
    %c0 = arith.constant 0 : index
    %c0_0 = arith.constant 0 : index
    %1 = vector.load %arg2[%c0, %c0_0] : memref<2x256xbf16, #tpu.memory_space<vmem>>, vector<2x256xbf16>
    %cst_1 = arith.constant dense<0.000000e+00> : vector<2x1xf32>
    %2 = tpu.matmul %1, %0, %cst_1 {dimension_numbers = #tpu.dot_dimension_numbers<[1], [0], [0], [1], [0, 0, 1, 1], [], []>} : vector<2x256xbf16>, vector<256x1xbf16>, vector<2x1xf32> -> vector<2x1xf32>
    %c1 = arith.constant 1 : index
    %c0_2 = arith.constant 0 : index
    %3 = vector.load %arg6[%c1, %c0_2] : memref<10x128xf32, #tpu.memory_space<vmem>>, vector<1x32xf32>
    %4 = vector.broadcast %2 : vector<2x1xf32> to vector<2x32xf32>
    %5 = vector.broadcast %3 : vector<1x32xf32> to vector<2x32xf32>
    %6 = arith.mulf %4, %5 : vector<2x32xf32>
    %c2 = arith.constant 2 : index
    %c0_3 = arith.constant 0 : index
    %7 = vector.load %arg6[%c2, %c0_3] : memref<10x128xf32, #tpu.memory_space<vmem>>, vector<1x32xf32>
    %8 = vector.broadcast %7 : vector<1x32xf32> to vector<2x32xf32>
    %9 = arith.addf %6, %8 : vector<2x32xf32>
    %c0_4 = arith.constant 0 : index
    %c0_5 = arith.constant 0 : index
    %10 = vector.load %arg6[%c0_4, %c0_5] : memref<10x128xf32, #tpu.memory_space<vmem>>, vector<1x32xf32>
    %c0_6 = arith.constant 0 : index
    %c0_7 = arith.constant 0 : index
    %c0_8 = arith.constant 0 : index
    %11 = vector.load %arg1[%c0_6, %c0_7, %c0_8] : memref<3x2x256xbf16, #tpu.memory_space<vmem>>, vector<1x2x256xbf16>
    %12 = vector.shape_cast %11 : vector<1x2x256xbf16> to vector<2x256xbf16>
    %cst_9 = arith.constant dense<0.000000e+00> : vector<2x1xf32>
    %13 = tpu.matmul %12, %0, %cst_9 {dimension_numbers = #tpu.dot_dimension_numbers<[1], [0], [0], [1], [0, 0, 1, 1], [], []>} : vector<2x256xbf16>, vector<256x1xbf16>, vector<2x1xf32> -> vector<2x1xf32>
    %c7 = arith.constant 7 : index
    %c0_10 = arith.constant 0 : index
    %14 = vector.load %arg6[%c7, %c0_10] : memref<10x128xf32, #tpu.memory_space<vmem>>, vector<1x32xf32>
    %15 = vector.broadcast %13 : vector<2x1xf32> to vector<2x32xf32>
    %16 = vector.broadcast %14 : vector<1x32xf32> to vector<2x32xf32>
    %17 = arith.mulf %15, %16 : vector<2x32xf32>
    %18 = vector.broadcast %10 : vector<1x32xf32> to vector<2x32xf32>
    %19 = arith.addf %18, %17 : vector<2x32xf32>
    %c1_11 = arith.constant 1 : index
    %c0_12 = arith.constant 0 : index
    %c0_13 = arith.constant 0 : index
    %20 = vector.load %arg1[%c1_11, %c0_12, %c0_13] : memref<3x2x256xbf16, #tpu.memory_space<vmem>>, vector<1x2x256xbf16>
    %21 = vector.shape_cast %20 : vector<1x2x256xbf16> to vector<2x256xbf16>
    %cst_14 = arith.constant dense<0.000000e+00> : vector<2x1xf32>
    %22 = tpu.matmul %21, %0, %cst_14 {dimension_numbers = #tpu.dot_dimension_numbers<[1], [0], [0], [1], [0, 0, 1, 1], [], []>} : vector<2x256xbf16>, vector<256x1xbf16>, vector<2x1xf32> -> vector<2x1xf32>
    %c8 = arith.constant 8 : index
    %c0_15 = arith.constant 0 : index
    %23 = vector.load %arg6[%c8, %c0_15] : memref<10x128xf32, #tpu.memory_space<vmem>>, vector<1x32xf32>
    %24 = vector.broadcast %22 : vector<2x1xf32> to vector<2x32xf32>
    %25 = vector.broadcast %23 : vector<1x32xf32> to vector<2x32xf32>
    %26 = arith.mulf %24, %25 : vector<2x32xf32>
    %27 = arith.addf %19, %26 : vector<2x32xf32>
    %c2_16 = arith.constant 2 : index
    %c0_17 = arith.constant 0 : index
    %c0_18 = arith.constant 0 : index
    %28 = vector.load %arg1[%c2_16, %c0_17, %c0_18] : memref<3x2x256xbf16, #tpu.memory_space<vmem>>, vector<1x2x256xbf16>
    %29 = vector.shape_cast %28 : vector<1x2x256xbf16> to vector<2x256xbf16>
    %cst_19 = arith.constant dense<0.000000e+00> : vector<2x1xf32>
    %30 = tpu.matmul %29, %0, %cst_19 {dimension_numbers = #tpu.dot_dimension_numbers<[1], [0], [0], [1], [0, 0, 1, 1], [], []>} : vector<2x256xbf16>, vector<256x1xbf16>, vector<2x1xf32> -> vector<2x1xf32>
    %c9 = arith.constant 9 : index
    %c0_20 = arith.constant 0 : index
    %31 = vector.load %arg6[%c9, %c0_20] : memref<10x128xf32, #tpu.memory_space<vmem>>, vector<1x32xf32>
    %32 = vector.broadcast %30 : vector<2x1xf32> to vector<2x32xf32>
    %33 = vector.broadcast %31 : vector<1x32xf32> to vector<2x32xf32>
    %34 = arith.mulf %32, %33 : vector<2x32xf32>
    %35 = arith.addf %27, %34 : vector<2x32xf32>
    %36 = arith.truncf %35 : vector<2x32xf32> to vector<2x32xbf16>
    %c0_21 = arith.constant 0 : index
    %c0_22 = arith.constant 0 : index
    %37 = vector.load %arg3[%c0_21, %c0_22] : memref<32x32xbf16, #tpu.memory_space<vmem>>, vector<32x32xbf16>
    %cst_23 = arith.constant dense<0.000000e+00> : vector<2x32xf32>
    %38 = tpu.matmul %36, %37, %cst_23 {dimension_numbers = #tpu.dot_dimension_numbers<[1], [0], [0], [1], [0, 0, 1, 1], [], []>} : vector<2x32xbf16>, vector<32x32xbf16>, vector<2x32xf32> -> vector<2x32xf32>
    %c3 = arith.constant 3 : index
    %c0_24 = arith.constant 0 : index
    %39 = vector.load %arg6[%c3, %c0_24] : memref<10x128xf32, #tpu.memory_space<vmem>>, vector<1x32xf32>
    %40 = vector.broadcast %39 : vector<1x32xf32> to vector<2x32xf32>
    %41 = arith.addf %38, %40 : vector<2x32xf32>
    %42 = arith.truncf %9 : vector<2x32xf32> to vector<2x32xbf16>
    %c0_25 = arith.constant 0 : index
    %c0_26 = arith.constant 0 : index
    %43 = vector.load %arg4[%c0_25, %c0_26] : memref<32x64xbf16, #tpu.memory_space<vmem>>, vector<32x64xbf16>
    %cst_27 = arith.constant dense<0.000000e+00> : vector<2x64xf32>
    %44 = tpu.matmul %42, %43, %cst_27 {dimension_numbers = #tpu.dot_dimension_numbers<[1], [0], [0], [1], [0, 0, 1, 1], [], []>} : vector<2x32xbf16>, vector<32x64xbf16>, vector<2x64xf32> -> vector<2x64xf32>
    %45 = vector.extract_strided_slice %44 {offsets = [0, 0], sizes = [2, 32], strides = [1, 1]} : vector<2x64xf32> to vector<2x32xf32>
    %c4 = arith.constant 4 : index
    %c0_28 = arith.constant 0 : index
    %46 = vector.load %arg6[%c4, %c0_28] : memref<10x128xf32, #tpu.memory_space<vmem>>, vector<1x32xf32>
    %47 = vector.broadcast %46 : vector<1x32xf32> to vector<2x32xf32>
    %48 = arith.addf %45, %47 : vector<2x32xf32>
    %49 = vector.extract_strided_slice %44 {offsets = [0, 32], sizes = [2, 32], strides = [1, 1]} : vector<2x64xf32> to vector<2x32xf32>
    %c5 = arith.constant 5 : index
    %c0_29 = arith.constant 0 : index
    %50 = vector.load %arg6[%c5, %c0_29] : memref<10x128xf32, #tpu.memory_space<vmem>>, vector<1x32xf32>
    %51 = vector.broadcast %50 : vector<1x32xf32> to vector<2x32xf32>
    %52 = arith.addf %49, %51 : vector<2x32xf32>
    %53 = arith.truncf %41 : vector<2x32xf32> to vector<2x32xbf16>
    %54 = vector.shape_cast %53 : vector<2x32xbf16> to vector<2x8x4xbf16>
    %55 = arith.truncf %48 : vector<2x32xf32> to vector<2x32xbf16>
    %56 = vector.shape_cast %55 : vector<2x32xbf16> to vector<2x8x4xbf16>
    %57 = arith.truncf %52 : vector<2x32xf32> to vector<2x32xbf16>
    %58 = vector.shape_cast %57 : vector<2x32xbf16> to vector<2x8x4xbf16>
    "tpu.trace_start"() <{level = 10 : i32, message = "lhd,shd->hls"}> : () -> ()
    %cst_30 = arith.constant dense<0.000000e+00> : vector<8x2x2xf32>
    %59 = tpu.matmul %54, %56, %cst_30 {dimension_numbers = #tpu.dot_dimension_numbers<[2], [2], [0], [0], [0, 1, 0, 0, 1, 0], [1], [1]>} : vector<2x8x4xbf16>, vector<2x8x4xbf16>, vector<8x2x2xf32> -> vector<8x2x2xf32>
    "tpu.trace_stop"() : () -> ()
    %cst_31 = arith.constant dense<0xFF800000> : vector<8x2xf32>
    %60 = vector.multi_reduction <maximumf>, %59, %cst_31 [2] : vector<8x2x2xf32> to vector<8x2xf32>
    %61 = vector.shape_cast %60 : vector<8x2xf32> to vector<8x2x1xf32>
    %62 = vector.broadcast %61 : vector<8x2x1xf32> to vector<8x2x2xf32>
    %63 = arith.subf %59, %62 : vector<8x2x2xf32>
    %64 = math.exp %63 : vector<8x2x2xf32>
    %cst_32 = arith.constant dense<0.000000e+00> : vector<8x2xf32>
    %65 = vector.multi_reduction <add>, %64, %cst_32 [2] : vector<8x2x2xf32> to vector<8x2xf32>
    %66 = vector.shape_cast %65 : vector<8x2xf32> to vector<8x2x1xf32>
    %67 = tpu.reciprocal %66 {approx = true} : vector<8x2x1xf32> -> vector<8x2x1xf32>
    %68 = vector.broadcast %67 : vector<8x2x1xf32> to vector<8x2x2xf32>
    %69 = arith.mulf %64, %68 : vector<8x2x2xf32>
    %70 = arith.truncf %69 : vector<8x2x2xf32> to vector<8x2x2xbf16>
    "tpu.trace_start"() <{level = 10 : i32, message = "hls,shd->hld"}> : () -> ()
    %cst_33 = arith.constant dense<0.000000e+00> : vector<8x2x4xf32>
    %71 = tpu.matmul %70, %58, %cst_33 {dimension_numbers = #tpu.dot_dimension_numbers<[2], [0], [1], [2], [0, 0, 0, 1, 1, 2], [0], [1]>} : vector<8x2x2xbf16>, vector<2x8x4xbf16>, vector<8x2x4xf32> -> vector<8x2x4xf32>
    "tpu.trace_stop"() : () -> ()
    %72 = tpu.transpose %71, [1, 0, 2] : vector<8x2x4xf32> -> vector<2x8x4xf32>
    %73 = vector.shape_cast %72 : vector<2x8x4xf32> to vector<2x32xf32>
    %74 = arith.truncf %73 : vector<2x32xf32> to vector<2x32xbf16>
    %c0_34 = arith.constant 0 : index
    %c0_35 = arith.constant 0 : index
    %75 = vector.load %arg5[%c0_34, %c0_35] : memref<32x128xbf16, #tpu.memory_space<vmem>>, vector<32x128xbf16>
    %cst_36 = arith.constant dense<0.000000e+00> : vector<2x128xf32>
    %76 = tpu.matmul %74, %75, %cst_36 {dimension_numbers = #tpu.dot_dimension_numbers<[1], [0], [0], [1], [0, 0, 1, 1], [], []>} : vector<2x32xbf16>, vector<32x128xbf16>, vector<2x128xf32> -> vector<2x128xf32>
    %c6 = arith.constant 6 : index
    %c0_37 = arith.constant 0 : index
    %77 = vector.load %arg6[%c6, %c0_37] : memref<10x128xf32, #tpu.memory_space<vmem>>, vector<1x128xf32>
    %78 = vector.broadcast %77 : vector<1x128xf32> to vector<2x128xf32>
    %79 = arith.addf %76, %78 : vector<2x128xf32>
    %c0_38 = arith.constant 0 : index
    %c0_39 = arith.constant 0 : index
    %80 = vector.load %arg7[%c0_38, %c0_39] : memref<2x128xf32, #tpu.memory_space<vmem>>, vector<2x128xf32>
    tpu.vector_store %arg7[%c0_38, %c0_39], %79 {strides = array<i32>} : memref<2x128xf32, #tpu.memory_space<vmem>>, vector<2x128xf32>,
    return
  }
  func.func @transform_0(%arg0: i32) -> (i32, i32, i32) {
    %c0_i32 = arith.constant 0 : i32
    %c0_i32_0 = arith.constant 0 : i32
    %c0_i32_1 = arith.constant 0 : i32
    %c0_i32_2 = arith.constant 0 : i32
    return %c0_i32, %c0_i32_0, %c0_i32_1 : i32, i32, i32
  }
  func.func @transform_1(%arg0: i32) -> (i32, i32) {
    %c0_i32 = arith.constant 0 : i32
    %c0_i32_0 = arith.constant 0 : i32
    %c0_i32_1 = arith.constant 0 : i32
    return %c0_i32, %c0_i32_0 : i32, i32
  }
  func.func @transform_2(%arg0: i32) -> (i32, i32) {
    %c0_i32 = arith.constant 0 : i32
    %c0_i32_0 = arith.constant 0 : i32
    %c0_i32_1 = arith.constant 0 : i32
    return %c0_i32, %c0_i32_0 : i32, i32
  }
  func.func @transform_3(%arg0: i32) -> (i32, i32) {
    %c0_i32 = arith.constant 0 : i32
    %c0_i32_0 = arith.constant 0 : i32
    %c0_i32_1 = arith.constant 0 : i32
    return %c0_i32, %c0_i32_0 : i32, i32
  }
  func.func @transform_4(%arg0: i32) -> (i32, i32) {
    %c0_i32 = arith.constant 0 : i32
    %c0_i32_0 = arith.constant 0 : i32
    %c0_i32_1 = arith.constant 0 : i32
    return %c0_i32, %c0_i32_0 : i32, i32
  }
  func.func @transform_5(%arg0: i32) -> (i32, i32) {
    %c0_i32 = arith.constant 0 : i32
    %c0_i32_0 = arith.constant 0 : i32
    %c0_i32_1 = arith.constant 0 : i32
    return %c0_i32, %c0_i32_0 : i32, i32
  }
  func.func @transform_6(%arg0: i32) -> (i32, i32) {
    %c0_i32 = arith.constant 0 : i32
    %c0_i32_0 = arith.constant 0 : i32
    %c0_i32_1 = arith.constant 0 : i32
    return %c0_i32, %c0_i32_0 : i32, i32
  }
}

</mosaic_0001>

<bundles_post_ra>
// kernel: tpu_custom_call.1
= control target key start
LH: loop header
LB: loop body
LE: loop exit
PB: predicated region body
PF: predicated region fallthrough
CT: control target
= control target key end

     0   :  { %11 = vsyncpa [#allocation3], 0  ;;  %s2754_s0 = inlined_call_operand.hbm [shape: bf16[3,2,256], index: 0, kind: input, shape index: {}]   ;;  %s2755_s1 = inlined_call_operand.vmem [shape: bf16[2,256], index: 1, kind: input, shape index: {}]   ;;  %s2756_s2 = inlined_call_operand.hbm [shape: bf16[32,32], index: 2, kind: input, shape index: {}]   ;;  %s2757_s3 = inlined_call_operand.hbm [shape: bf16[32,64], index: 3, kind: input, shape index: {}]   ;;  %s2758_s4 = inlined_call_operand.hbm [shape: bf16[32,128], index: 4, kind: input, shape index: {}]   ;;  %s2759_s5 = inlined_call_operand.vmem [shape: f32[10,128], index: 5, kind: input, shape index: {}]   ;;  %s2760_s6 = inlined_call_operand.hbm [shape: f32[2,128], index: 6, kind: output, shape index: {}]  }
   0x1   :  { %12 = vsyncpa [#allocation6], 0 }
   0x2   :  { %13 = vsyncpa [#allocation9], 0 }
   0x3   :  { %14 = vsyncpa [#allocation4], 0  ;;  %s2300_s21 = smov [#allocation5]   ;;  %s2182_s25 = scalar_lea.hbm %s2756_s2, 256 }
   0x4   :  { %s34_s22 = sshll.u32 %s2300_s21, 4  ;;  %p2183_p0 = scmp.ne.s32.totalorder %s2756_s2, %s2182_s25  ;;  %s35_s22 = int_to_ptr.vmem [resolvable:$true] %s34_s22 }
   0x5   :  { %p2186_p1 = scmp.lt.u32.totalorder %s2182_s25, %s2756_s2 }
   0x7   :  { %p2188_p2 = pnand %p2186_p1, %p2183_p0 }
   0x9   :  { %2191 = shalt.err (!%p2188_p2)
}
   0xa   :  { %s2192_s30 = scalar_lea.vmem %s35_s22, 256  ;;  %p2197_p4 = scmp.lt.s32.totalorder %s35_s22, %s35_s22 }
   0xb   :  { %p2193_p3 = scmp.ne.s32.totalorder %s35_s22, %s2192_s30  ;;  %p2198_p5 = scmp.lt.s32.totalorder %s2192_s30, %s2192_s30 }
   0xd   :  { %p2199_p6 = por %p2198_p5, %p2197_p4 }
   0xf   :  { %p2200_p7 = pnand %p2199_p6, %p2193_p3 }
  0x11   :  { %2203 = shalt.err (!%p2200_p7)
}
  0x12   :  { %s2301_s7 = smov 64   ;;  %s2302_s8 = smov 4  }
  0x13   :  { %40 = dma.hbm_to_vmem [thread:$0]  %s2756_s2, 256, %s35_s22, [#allocation6], %s2301_s7, %s2301_s7, %s2302_s8  }
  0x14   :  { %s2303_s11 = smov [#allocation2]   ;;  %s2204_s15 = scalar_lea.hbm %s2754_s0, 96 }
  0x15   :  { %s20_s12 = sshll.u32 %s2303_s11, 4  ;;  %p2205_p8 = scmp.ne.s32.totalorder %s2754_s0, %s2204_s15  ;;  %s21_s12 = int_to_ptr.vmem [resolvable:$true] %s20_s12 }
  0x16   :  { %p2208_p9 = scmp.lt.u32.totalorder %s2204_s15, %s2754_s0 }
  0x18   :  { %p2210_p10 = pnand %p2208_p9, %p2205_p8 }
  0x1a   :  { %2213 = shalt.err (!%p2210_p10)
}
  0x1b   :  { %s2214_s20 = scalar_lea.vmem %s21_s12, 96  ;;  %p2219_p12 = scmp.lt.s32.totalorder %s21_s12, %s21_s12 }
  0x1c   :  { %p2215_p11 = scmp.ne.s32.totalorder %s21_s12, %s2214_s20  ;;  %p2220_p13 = scmp.lt.s32.totalorder %s2214_s20, %s2214_s20 }
  0x1e   :  { %p2221_p0 = por %p2220_p13, %p2219_p12 }
  0x20   :  { %p2222_p1 = pnand %p2221_p0, %p2215_p11 }
  0x22   :  { %2225 = shalt.err (!%p2222_p1)
}
  0x23   :  { %s2304_s2 = smov 32   ;;  %s2305_s21 = smov 2  }
  0x24   :  { %26 = dma.hbm_to_vmem [thread:$0]  %s2754_s0, 96, %s21_s12, [#allocation3], %s2304_s2, %s2304_s2, %s2305_s21  }
  0x25   :  { %s2306_s24 = smov [#allocation7]   ;;  %s2307_s26 = smov [#allocation8]  }
  0x26   :  { %s46_s25 = sshll.u32 %s2306_s24, 4  ;;  %s58_s27 = sshll.u32 %s2307_s26, 4  ;;  %s47_s25 = int_to_ptr.vmem [resolvable:$true] %s46_s25  ;;  %s2394_s27 = int_to_ptr.vmem [resolvable:$true] %s58_s27 }
  0x27   :  { %s2226_s30 = scalar_lea.hbm %s2757_s3, 256 }
  0x28   :  { %p2227_p2 = scmp.ne.s32.totalorder %s2757_s3, %s2226_s30  ;;  %p2230_p3 = scmp.lt.u32.totalorder %s2226_s30, %s2757_s3 }
  0x2a   :  { %p2232_p4 = pnand %p2230_p3, %p2227_p2 }
  0x2c   :  { %2235 = shalt.err (!%p2232_p4)
}
  0x2d   :  { %s2236_s0 = scalar_lea.vmem %s47_s25, 256  ;;  %p2241_p6 = scmp.lt.s32.totalorder %s47_s25, %s47_s25 }
  0x2e   :  { %p2237_p5 = scmp.ne.s32.totalorder %s47_s25, %s2236_s0  ;;  %p2242_p7 = scmp.lt.s32.totalorder %s2236_s0, %s2236_s0 }
  0x30   :  { %p2243_p8 = por %p2242_p7, %p2241_p6 }
  0x32   :  { %p2244_p9 = pnand %p2243_p8, %p2237_p5 }
  0x34   :  { %2247 = shalt.err (!%p2244_p9)
}
  0x35   :  { %52 = dma.hbm_to_vmem [thread:$0]  %s2757_s3, 256, %s47_s25, [#allocation6], %s2301_s7, %s2301_s7, %s2302_s8  }
  0x36   :  { %s2248_s17 = scalar_lea.hbm %s2758_s4, 256 }
  0x37   :  { %p2249_p10 = scmp.ne.s32.totalorder %s2758_s4, %s2248_s17  ;;  %p2252_p11 = scmp.lt.u32.totalorder %s2248_s17, %s2758_s4 }
  0x39   :  { %p2254_p12 = pnand %p2252_p11, %p2249_p10 }
  0x3b   :  { %2257 = shalt.err (!%p2254_p12)
}
  0x3c   :  { %s2258_s22 = scalar_lea.vmem %s2394_s27, 256  ;;  %p2263_p0 = scmp.lt.s32.totalorder %s2394_s27, %s2394_s27 }
  0x3d   :  { %p2259_p13 = scmp.ne.s32.totalorder %s2394_s27, %s2258_s22  ;;  %p2264_p1 = scmp.lt.s32.totalorder %s2258_s22, %s2258_s22 }
  0x3f   :  { %p2265_p2 = por %p2264_p1, %p2263_p0 }
  0x41   :  { %p2266_p3 = pnand %p2265_p2, %p2259_p13 }
  0x43   :  { %2269 = shalt.err (!%p2266_p3)
}
  0x44   :  { %64 = dma.hbm_to_vmem [thread:$0]  %s2758_s4, 256, %s2394_s27, [#allocation9], %s2301_s7, %s2301_s7, %s2302_s8  }
  0x45   :  { %2292 = dma.done.wait [#allocation3], 96  }
  0x46   :  { %2293 = vsyncadd [#allocation3], 4294967200 }
  0x47   :  { %2294 = dma.done.wait [#allocation6], 512  }
  0x48   :  { %2295 = vsyncadd [#allocation6], 4294966784 }
  0x49   :  { %2296 = dma.done.wait [#allocation9], 256  }
  0x4a   :  { %2297 = vsyncadd [#allocation9], 4294967040  ;;  %v94_v0 = vlaneseq  ;;  %v2308_v1 = vmov 998259584   ;;  %v2309_v2 = vmov 1966171168  }
  0x4b   :  { %1863 = vmatprep.subr.bf16.mxu0 %v2308_v1  ;;  %1885 = vmatprep.subr.bf16.mxu1 %v2308_v1  ;;  %v92_v3 = vunpack.c.l.s4 %v2309_v2  ;;  %v1823_v7 = vld.sshfl [vmem:[%s2755_s1] sm:$0x11 pattern:$0x75316420]  ;;  %v2310_v23 = vmov 0   ;;  %v2144_v24 = vld [vmem:[#allocation7] sm:$0xff]  }
  0x4c   :  { %1864 = vmatpush3.bf16.msra.mxu0 %v2308_v1  ;;  %1886 = vmatpush3.bf16.msra.mxu1 %v2308_v1  ;;  %v2435_v4 = vshrl.u32 %v94_v0, 7  ;;  %v90_v8 = vcombine.high %v1823_v7, %v1823_v7  ;;  %v1826_v9 = vld.sshfl [vmem:[#allocation2] sm:$0x11 pattern:$0x75316420]  ;;  %v2311_v25 = vmov 0.0  }
  0x4d   :  { %1865 = vmatprep.subr.bf16.mxu0 %v2308_v1  ;;  %1887 = vmatprep.subr.bf16.mxu1 %v2308_v1  ;;  %v93_v5 = vunpack.c.0.s8 %v92_v3  ;;  %v174_v10 = vcombine.high %v1826_v9, %v1826_v9  ;;  %v1829_v13 = vld.sshfl [vmem:[#allocation2 + $0x2] sm:$0x11 pattern:$0x75316420]  ;;  %vm2312_vm0 = vmmov 0   ;;  %v2146_v47 = vld [vmem:[#allocation5] sm:$0xff]  }
  0x4e   :  { %v1831_v14 = vld.sshfl [vmem:[#allocation2 + $0x4] sm:$0x11 pattern:$0x75316420]  ;;  %v257_v15 = vcombine.high %v1829_v13, %v1829_v13  ;;  %2142 = vset.pattern.permute.xlu0 %v2310_v23  ;;  %2143 = vset.pattern.permute.xlu1 %v2310_v23  ;;  %v2147_v48 = vld [vmem:[#allocation5 + $0x8] sm:$0xff]   ;;  %vm427_vm1 = vcmask 261120  }
  0x4f   :  { %v2442_v6 = vsub.s32 %v93_v5, %v2435_v4  ;;  %v336_v16 = vcombine.high %v1831_v14, %v1831_v14  ;;  %v2145_v36 = vld [vmem:[#allocation7 + $0x8] sm:$0xff]   ;;  %v1824_v49 = vld [vmem:[%s2759_s5 + $0x1] ss:$0 sm:$0xff]  ;;  %v1825_v50 = vld [vmem:[%s2759_s5 + $0x2] ss:$0 sm:$0xff]  ;;  %s2313_s14 = smov 120  }
  0x50   :  { %1866 = vmatpush3.bf16.msra.mxu0 %v2308_v1  ;;  %1888 = vmatpush3.bf16.msra.mxu1 %v2308_v1  ;;  %v1827_v55 = vld [vmem:[%s2759_s5 + $0x7] ss:$0 sm:$0xff]  ;;  %v1830_v57 = vld [vmem:[%s2759_s5 + $0x8] ss:$0 sm:$0xff]  ;;  %v1828_v59 = vld [vmem:[%s2759_s5] ss:$0 sm:$0xff] }
  0x51   :  { %1867 = vmatprep.subr.bf16.mxu0 %v2308_v1  ;;  %1889 = vmatprep.subr.bf16.mxu1 %v2308_v1  ;;  %v104_v11 = vrot.slane %v90_v8, %v2442_v6  ;;  %v188_v12 = vrot.slane %v174_v10, %v2442_v6  ;;  %v97_v17 = vrot.slane %v1823_v7, %v2442_v6  ;;  %v1832_v62 = vld [vmem:[%s2759_s5 + $0x9] ss:$0 sm:$0xff]  ;;  %s2314_s15 = smov 124   ;;  %s2315_s16 = smov 112   ;;  %vm734_vm2 = vcmask 1041408  }
  0x52   :  { %v181_v18 = vrot.slane %v1826_v9, %v2442_v6  ;;  %v271_v19 = vrot.slane %v257_v15, %v2442_v6  ;;  %v350_v20 = vrot.slane %v336_v16, %v2442_v6  ;;  %v264_v21 = vrot.slane %v1829_v13, %v2442_v6  ;;  %s2316_s17 = smov 116   ;;  %s2317_s18 = smov 104   ;;  %v1833_v13 = vld [vmem:[%s2759_s5 + $0x3] ss:$0 sm:$0xff] }
  0x53   :  { %139 = vmatprep.mubr.bf16.mxu0 %v104_v11  ;;  %223 = vmatprep.mubr.bf16.mxu1 %v188_v12  ;;  %v343_v22 = vrot.slane %v1831_v14, %v2442_v6  ;;  %v1840_v6 = vld [vmem:[%s2759_s5 + $0x4] ss:$0 sm:$0xff]  ;;  %s2318_s19 = smov 108   ;;  %s2319_s20 = smov 100   ;;  %vm730_vm3 = vcmask 31744   ;;  %vm1100_vm4 = vcmask 9216  }
  0x54   :  { %1868 = vmatpush3.bf16.msra.mxu0 %v2308_v1  ;;  %1890 = vmatpush3.bf16.msra.mxu1 %v2308_v1  ;;  %vm1203_vm5 = vcmask 1040384   ;;  %vm1199_vm6 = vcmask 15360   ;;  %s2323_s4 = smov 8   ;;  %s2324_s7 = smov 16   ;;  %vm1728_vm7 = vcmask 64512   ;;  %vm1730_vm8 = vcmask 97280  }
  0x55   :  { %1869 = vmatprep.subr.bf16.mxu0 %v2308_v1  ;;  %1891 = vmatprep.subr.bf16.mxu1 %v2308_v1  ;;  %s2325_s1 = smov 12   ;;  %s2326_s24 = smov 24   ;;  %vm1732_vm9 = vcmask 130048   ;;  %vm1734_vm10 = vcmask 162816   ;;  %vm1736_vm11 = vcmask 195584   ;;  %vm1738_vm12 = vcmask 228352  }
  0x56   :  { %s2327_s25 = smov 20   ;;  %s2328_s26 = smov 28  }
  0x57   :  { %s2329_s28 = smov [#allocation10]  }
  0x58   :  { %1870 = vmatpush3.bf16.msra.mxu0 %v2308_v1  ;;  %1892 = vmatpush3.bf16.msra.mxu1 %v2308_v1  ;;  %s1812_s29 = sshll.u32 %s2329_s28, 4  ;;  %s1813_s29 = int_to_ptr.vmem [resolvable:$true] %s1812_s29 }
  0x59   :  { %1871 = vmatprep.subr.bf16.mxu0 %v2308_v1  ;;  %1893 = vmatprep.subr.bf16.mxu1 %v2308_v1  ;;  %s2270_s30 = scalar_lea.vmem %s1813_s29, 32  ;;  %p2275_p5 = scmp.lt.s32.totalorder %s1813_s29, %s1813_s29 }
  0x5a   :  { %p2271_p4 = scmp.ne.s32.totalorder %s1813_s29, %s2270_s30  ;;  %p2276_p6 = scmp.lt.s32.totalorder %s2270_s30, %s2270_s30 }
  0x5c   :  { %1872 = vmatpush3.bf16.msra.mxu0 %v2308_v1  ;;  %1894 = vmatpush3.bf16.msra.mxu1 %v2308_v1  ;;  %p2277_p7 = por %p2276_p6, %p2275_p5 }
  0x5d   :  { %1873 = vmatprep.subr.bf16.mxu0 %v2308_v1  ;;  %1895 = vmatprep.subr.bf16.mxu1 %v2308_v1 }
  0x5e   :  { %p2278_p8 = pnand %p2277_p7, %p2271_p4 }
  0x60   :  { %1874 = vmatpush3.bf16.msra.mxu0 %v2308_v1  ;;  %1896 = vmatpush3.bf16.msra.mxu1 %v2308_v1 }
  0x61   :  { %1875 = vmatprep.subr.bf16.mxu0 %v2308_v1  ;;  %1897 = vmatprep.subr.bf16.mxu1 %v2308_v1 }
  0x64   :  { %1876 = vmatpush3.bf16.msra.mxu0 %v2308_v1  ;;  %1898 = vmatpush3.bf16.msra.mxu1 %v2308_v1 }
  0x65   :  { %1877 = vmatprep.subr.bf16.mxu0 %v2308_v1  ;;  %1899 = vmatprep.subr.bf16.mxu1 %v2308_v1 }
  0x68   :  { %1878 = vmatpush3.bf16.msra.mxu0 %v2308_v1  ;;  %1900 = vmatpush3.bf16.msra.mxu1 %v2308_v1 }
  0x69   :  { %1907 = vmatprep.subr.bf16.mxu0 %v2308_v1  ;;  %1929 = vmatprep.subr.bf16.mxu1 %v2308_v1 }
  0x6b   :  { %140 = vmatmul.mubr.bf16.vlgmr.msra.gmra.mrb[0].mxu0 %v97_v17  ;;  %224 = vmatmul.mubr.bf16.vlgmr.msra.gmra.mrb[0].mxu1 %v181_v18 }
  0x6c   :  { %1908 = vmatpush3.bf16.msra.mxu0 %v2308_v1  ;;  %1930 = vmatpush3.bf16.msra.mxu1 %v2308_v1 }
  0x6d   :  { %1909 = vmatprep.subr.bf16.mxu0 %v2308_v1  ;;  %1931 = vmatprep.subr.bf16.mxu1 %v2308_v1 }
  0x6e   :  { %306 = vmatprep.mubr.bf16.mxu0 %v271_v19  ;;  %385 = vmatprep.mubr.bf16.mxu1 %v350_v20 }
  0x70   :  { %1910 = vmatpush3.bf16.msra.mxu0 %v2308_v1  ;;  %1932 = vmatpush3.bf16.msra.mxu1 %v2308_v1 }
  0x71   :  { %1911 = vmatprep.subr.bf16.mxu0 %v2308_v1  ;;  %1933 = vmatprep.subr.bf16.mxu1 %v2308_v1 }
  0x74   :  { %1912 = vmatpush3.bf16.msra.mxu0 %v2308_v1  ;;  %1934 = vmatpush3.bf16.msra.mxu1 %v2308_v1 }
  0x75   :  { %1913 = vmatprep.subr.bf16.mxu0 %v2308_v1  ;;  %1935 = vmatprep.subr.bf16.mxu1 %v2308_v1 }
  0x78   :  { %1914 = vmatpush3.bf16.msra.mxu0 %v2308_v1  ;;  %1936 = vmatpush3.bf16.msra.mxu1 %v2308_v1 }
  0x79   :  { %1915 = vmatprep.subr.bf16.mxu0 %v2308_v1  ;;  %1937 = vmatprep.subr.bf16.mxu1 %v2308_v1 }
  0x7c   :  { %1916 = vmatpush3.bf16.msra.mxu0 %v2308_v1  ;;  %1938 = vmatpush3.bf16.msra.mxu1 %v2308_v1 }
  0x7d   :  { %1917 = vmatprep.subr.bf16.mxu0 %v2308_v1  ;;  %1939 = vmatprep.subr.bf16.mxu1 %v2308_v1 }
  0x80   :  { %1918 = vmatpush3.bf16.msra.mxu0 %v2308_v1  ;;  %1940 = vmatpush3.bf16.msra.mxu1 %v2308_v1 }
  0x81   :  { %1919 = vmatprep.subr.bf16.mxu0 %v2308_v1  ;;  %1941 = vmatprep.subr.bf16.mxu1 %v2308_v1 }
  0x84   :  { %1920 = vmatpush3.bf16.msra.mxu0 %v2308_v1  ;;  %1942 = vmatpush3.bf16.msra.mxu1 %v2308_v1 }
  0x85   :  { %1921 = vmatprep.subr.bf16.mxu0 %v2308_v1  ;;  %1943 = vmatprep.subr.bf16.mxu1 %v2308_v1 }
  0x88   :  { %1922 = vmatpush3.bf16.msra.mxu0 %v2308_v1  ;;  %1944 = vmatpush3.bf16.msra.mxu1 %v2308_v1 }
  0x89   :  { %2000 = vmatprep.subr.bf16.mxu1 %v2311_v25  ;;  %1992 = vmatprep.subr.bf16.mxu0 %v2311_v25 }
  0x8b   :  { %307 = vmatmul.mubr.bf16.vlgmr.msra.gmra.mrb[4].mxu0 %v264_v21  ;;  %386 = vmatmul.mubr.bf16.vlgmr.msra.gmra.mrb[4].mxu1 %v343_v22 }
  0x8c   :  { %2001 = vmatpush3.bf16.msra.mxu1 %v2144_v24  ;;  %2004 = vmatprep.mubr.msk.bf16.mxu1 %vm2312_vm0, %v2311_v25 }
  0x8d   :  { %2002 = vmatprep.subr.bf16.mxu1 %v2311_v25  ;;  %1996 = vmatprep.mubr.msk.bf16.mxu0 %vm2312_vm0, %v2311_v25 }
  0x8e   :  { %1993 = vmatpush3.bf16.msra.mxu0 %v2146_v47 }
  0x8f   :  { %1994 = vmatprep.subr.bf16.mxu0 %v2311_v25 }
  0x90   :  { %2003 = vmatpush3.bf16.msra.mxu1 %v2145_v36 }
  0x91   :  { %2014 = vmatprep.subr.bf16.mxu1 %v2311_v25 }
  0x92   :  { %1995 = vmatpush3.bf16.msra.mxu0 %v2147_v48 }
  0x93   :  { %2008 = vmatprep.subr.bf16.mxu0 %v2311_v25 }
 0x13e   :  { %v1879_v26 = vpop.f32.mrb[0].mxu0  ;;  %v1901_v27 = vpop.f32.mrb[0].mxu1 }
 0x13f   :  { %v1880_v28 = vpop.f32.mrb[1].mxu0  ;;  %v1902_v29 = vpop.f32.mrb[1].mxu1 }
 0x140   :  { %v1881_v30 = vadd.f32 %v1880_v28, %v1879_v26  ;;  %v1882_v31 = vpop.f32.mrb[2].mxu0  ;;  %v1903_v32 = vadd.f32 %v1902_v29, %v1901_v27  ;;  %v1904_v33 = vpop.f32.mrb[2].mxu1 }
 0x141   :  { %v1883_v34 = vpop.f32.mrb[3].mxu0  ;;  %v1905_v35 = vpop.f32.mrb[3].mxu1 }
 0x142   :  { %150 = vperm.xlu0 %2142, %v1881_v30   ;;  %v1841_v30 = vld [vmem:[%s2759_s5 + $0x5] ss:$0 sm:$0xff] }
 0x146   :  { %234 = vperm.xlu0 %2142, %v1903_v32  }
 0x15e   :  { %v1923_v37 = vpop.f32.mrb[4].mxu0  ;;  %v1945_v38 = vpop.f32.mrb[4].mxu1 }
 0x15f   :  { %v1924_v39 = vpop.f32.mrb[5].mxu0  ;;  %v1946_v40 = vpop.f32.mrb[5].mxu1 }
 0x160   :  { %v1925_v41 = vadd.f32 %v1924_v39, %v1923_v37  ;;  %v1947_v42 = vadd.f32 %v1946_v40, %v1945_v38  ;;  %v1926_v43 = vpop.f32.mrb[6].mxu0  ;;  %v1948_v44 = vpop.f32.mrb[6].mxu1 }
 0x161   :  { %v1927_v45 = vpop.f32.mrb[7].mxu0  ;;  %v1949_v46 = vpop.f32.mrb[7].mxu1 }
 0x162   :  { %317 = vperm.xlu1 %2143, %v1925_v41  }
 0x166   :  { %396 = vperm.xlu1 %2143, %v1947_v42  }
 0x1c1   :  { %v151_v51 = vpop.permute.xlu0 %150 }
 0x1c2   :  { %v157_v52 = vmul.f32 %v1824_v49, %v151_v51 }
 0x1c4   :  { %v163_v53 = vadd.f32 %v1825_v50, %v157_v52 }
 0x1c5   :  { %v235_v56 = vpop.permute.xlu0 %234 }
 0x1c6   :  { %v471_v54 = vpack.c.bf16 %v163_v53, %v163_v53  ;;  %v241_v58 = vmul.f32 %v1827_v55, %v235_v56 }
 0x1c8   :  { %2005 = vmatmul.mubr.msk.bf16.vlgmr.msra.gmra.mrb[8].mxu1 %vm427_vm1, %v471_v54  ;;  %v246_v63 = vadd.f32 %v1828_v59, %v241_v58 }
 0x1c9   :  { %2016 = vmatprep.mubr.msk.bf16.mxu1 %vm2312_vm0, %v2311_v25 }
 0x1e1   :  { %v318_v60 = vpop.permute.xlu1 %317 }
 0x1e2   :  { %v324_v61 = vmul.f32 %v1830_v57, %v318_v60 }
 0x1e4   :  { %v325_v1 = vadd.f32 %v324_v61, %v246_v63 }
 0x1e5   :  { %v397_v0 = vpop.permute.xlu1 %396 }
 0x1e6   :  { %v403_v2 = vmul.f32 %v1832_v62, %v397_v0 }
 0x1e8   :  { %v404_v3 = vadd.f32 %v403_v2, %v325_v1 }
 0x1ea   :  { %v405_v5 = vpack.c.bf16 %v404_v3, %v404_v3 }
 0x1ec   :  { %1997 = vmatmul.mubr.msk.bf16.vlgmr.msra.gmra.mrb[8].mxu0 %vm427_vm1, %v405_v5 }
 0x1ed   :  { %2010 = vmatprep.mubr.msk.bf16.mxu0 %vm2312_vm0, %v2311_v25 }
 0x29b   :  { %v2548_v7 = vpop.f32.mrb[8].mxu1 }
 0x29c   :  { %v536_v8 = vadd.f32 %v1840_v6, %v2548_v7  ;;  %v2006_v9 = vpop.f32.mrb[9].mxu1 }
 0x29d   :  { %v528_v10 = vpop.f32.mrb[10].mxu1 }
 0x29e   :  { %v563_v11 = vpack.c.bf16 %v536_v8, %v536_v8  ;;  %v2007_v12 = vpop.f32.mrb[11].mxu1 }
 0x2a0   :  { %568 = vrot.lane.b32.xlu1 %v563_v11, %s2313_s14  ;;  %565 = vrot.lane.b32.xlu0 %v563_v11, %s2314_s15 }
 0x2a4   :  { %574 = vrot.lane.b32.xlu1 %v563_v11, %s2315_s16  ;;  %571 = vrot.lane.b32.xlu0 %v563_v11, %s2316_s17 }
 0x2a8   :  { %580 = vrot.lane.b32.xlu1 %v563_v11, %s2317_s18  ;;  %577 = vrot.lane.b32.xlu0 %v563_v11, %s2318_s19 }
 0x2ac   :  { %583 = vrot.lane.b32.xlu0 %v563_v11, %s2319_s20 }
 0x2bf   :  { %v465_v14 = vpop.f32.mrb[8].mxu0 }
 0x2c0   :  { %v466_v15 = vadd.f32 %v1833_v13, %v465_v14  ;;  %v1998_v16 = vpop.f32.mrb[9].mxu0 }
 0x2c1   :  { %v468_v17 = vpop.f32.mrb[10].mxu0 }
 0x2c2   :  { %v547_v18 = vpack.c.bf16 %v466_v15, %v466_v15  ;;  %v1999_v19 = vpop.f32.mrb[11].mxu0 }
 0x2c4   :  { %549 = vrot.lane.b32.xlu1 %v547_v18, %s2314_s15 }
 0x2c8   :  { %553 = vrot.lane.b32.xlu1 %v547_v18, %s2316_s17 }
 0x2ca   :  { %602 = vxpose.xlu0.c.b16.start.end [1/1] (short) (narrow) %v563_v11, 16 }
 0x2cc   :  { %557 = vrot.lane.b32.xlu1 %v547_v18, %s2318_s19 }
 0x2d3   :  { %551 = vrot.lane.b32.xlu0 %v547_v18, %s2313_s14 }
 0x2d7   :  { %555 = vrot.lane.b32.xlu0 %v547_v18, %s2315_s16 }
 0x2db   :  { %559 = vrot.lane.b32.xlu0 %v547_v18, %s2317_s18 }
 0x312   :  { %v569_v20 = vpop.permute.xlu1 %568  ;;  %v566_v21 = vpop.permute.xlu0 %565 }
 0x313   :  { %634 = vxpose.xlu0.c.b16.start.end [1/1] (short) (narrow) %v569_v20, 16  ;;  %618 = vxpose.xlu1.c.b16.start.end [1/1] (short) (narrow) %v566_v21, 16 }
 0x316   :  { %v575_v22 = vpop.permute.xlu1 %574  ;;  %v572_v23 = vpop.permute.xlu0 %571 }
 0x317   :  { %666 = vxpose.xlu0.c.b16.start.end [1/1] (short) (narrow) %v575_v22, 16  ;;  %561 = vrot.lane.b32.xlu1 %v547_v18, %s2319_s20 }
 0x31a   :  { %v578_v24 = vpop.permute.xlu0 %577  ;;  %v581_v29 = vpop.permute.xlu1 %580 }
 0x31b   :  { %682 = vxpose.xlu0.c.b16.start.end [1/1] (short) (narrow) %v578_v24, 16 }
 0x31e   :  { %v584_v26 = vpop.permute.xlu0 %583 }
 0x31f   :  { %714 = vxpose.xlu0.c.b16.start.end [1/1] (short) (narrow) %v584_v26, 16 }
 0x330   :  { %v610_v27 = vpop.trf.xlu0 }
 0x331   :  { %v736_v28 = vsel %vm734_vm2, %v610_v27, 0 }
 0x332   :  { %2009 = vmatpush3.bf16.msra.mxu0 %v736_v28 }
 0x333   :  { %2020 = vmatprep.subr.bf16.mxu0 %v2311_v25 }
 0x335   :  { %2011 = vmatmul.mubr.msk.bf16.vlgmr.msra.gmra.mrb[12].mxu0 %vm730_vm3, %v547_v18 }
 0x336   :  { %2022 = vmatprep.mubr.msk.bf16.mxu0 %vm2312_vm0, %v2311_v25  ;;  %v550_v31 = vpop.permute.xlu1 %549 }
 0x33a   :  { %650 = vxpose.xlu1.c.b16.start.end [1/1] (short) (narrow) %v572_v23, 16  ;;  %v554_v33 = vpop.permute.xlu1 %553 }
 0x33e   :  { %698 = vxpose.xlu1.c.b16.start.end [1/1] (short) (narrow) %v581_v29, 16  ;;  %v558_v35 = vpop.permute.xlu1 %557 }
 0x342   :  { %543 = vrot.lane.b32.xlu1 %v1841_v30, %s2304_s2  ;;  %s2320_s2 = smov 96  }
 0x345   :  { %v552_v32 = vpop.permute.xlu0 %551 }
 0x349   :  { %v556_v34 = vpop.permute.xlu0 %555 }
 0x34d   :  { %v560_v36 = vpop.permute.xlu0 %559 }
 0x379   :  { %v626_v37 = vpop.trf.xlu1  ;;  %v642_v38 = vpop.trf.xlu0 }
 0x37a   :  { %v782_v39 = vsel %vm734_vm2, %v626_v37, 0  ;;  %v828_v40 = vsel %vm734_vm2, %v642_v38, 0 }
 0x37b   :  { %2015 = vmatpush3.bf16.msra.mxu1 %v782_v39  ;;  %2021 = vmatpush3.bf16.msra.mxu0 %v828_v40 }
 0x37c   :  { %2032 = vmatprep.subr.bf16.mxu0 %v2311_v25  ;;  %2026 = vmatprep.subr.bf16.mxu1 %v2311_v25 }
 0x37d   :  { %v674_v41 = vpop.trf.xlu0 }
 0x37e   :  { %2017 = vmatmul.mubr.msk.bf16.vlgmr.msra.gmra.mrb[12].mxu1 %vm730_vm3, %v550_v31  ;;  %2023 = vmatmul.mubr.msk.bf16.vlgmr.msra.gmra.mrb[16].mxu0 %vm730_vm3, %v552_v32  ;;  %v920_v42 = vsel %vm734_vm2, %v674_v41, 0 }
 0x37f   :  { %2033 = vmatpush3.bf16.msra.mxu0 %v920_v42  ;;  %2034 = vmatprep.mubr.msk.bf16.mxu0 %vm2312_vm0, %v2311_v25 }
 0x380   :  { %2028 = vmatprep.mubr.msk.bf16.mxu1 %vm2312_vm0, %v2311_v25  ;;  %2044 = vmatprep.subr.bf16.mxu0 %v2311_v25 }
 0x381   :  { %v690_v45 = vpop.trf.xlu0 }
 0x382   :  { %v966_v47 = vsel %vm734_vm2, %v690_v45, 0 }
 0x385   :  { %v722_v50 = vpop.trf.xlu0 }
 0x386   :  { %2035 = vmatmul.mubr.msk.bf16.vlgmr.msra.gmra.mrb[20].mxu0 %vm730_vm3, %v556_v34  ;;  %v1058_v51 = vsel %vm734_vm2, %v722_v50, 0 }
 0x387   :  { %2046 = vmatprep.mubr.msk.bf16.mxu0 %vm2312_vm0, %v2311_v25 }
 0x389   :  { %v562_v43 = vpop.permute.xlu1 %561 }
 0x3a0   :  { %v658_v44 = vpop.trf.xlu1 }
 0x3a1   :  { %v874_v46 = vsel %vm734_vm2, %v658_v44, 0 }
 0x3a2   :  { %2027 = vmatpush3.bf16.msra.mxu1 %v874_v46 }
 0x3a3   :  { %2038 = vmatprep.subr.bf16.mxu1 %v2311_v25 }
 0x3a4   :  { %v706_v48 = vpop.trf.xlu1 }
 0x3a5   :  { %v1012_v49 = vsel %vm734_vm2, %v706_v48, 0  ;;  %2029 = vmatmul.mubr.msk.bf16.vlgmr.msra.gmra.mrb[16].mxu1 %vm730_vm3, %v554_v33 }
 0x3a6   :  { %2045 = vmatpush3.bf16.msra.mxu0 %v1012_v49  ;;  %2039 = vmatpush3.bf16.msra.mxu1 %v966_v47 }
 0x3a7   :  { %2040 = vmatprep.mubr.msk.bf16.mxu1 %vm2312_vm0, %v2311_v25  ;;  %2050 = vmatprep.subr.bf16.mxu1 %v2311_v25 }
 0x3a8   :  { %2056 = vmatprep.subr.bf16.mxu0 %v2311_v25 }
 0x3a9   :  { %2047 = vmatmul.mubr.msk.bf16.vlgmr.msra.gmra.mrb[24].mxu0 %vm730_vm3, %v560_v36 }
 0x3aa   :  { %2058 = vmatprep.mubr.msk.bf16.mxu0 %vm2312_vm0, %v2311_v25 }
 0x3ad   :  { %2041 = vmatmul.mubr.msk.bf16.vlgmr.msra.gmra.mrb[20].mxu1 %vm730_vm3, %v558_v35 }
 0x3ae   :  { %2051 = vmatpush3.bf16.msra.mxu1 %v1058_v51  ;;  %2052 = vmatprep.mubr.msk.bf16.mxu1 %vm2312_vm0, %v2311_v25 }
 0x3af   :  { %2062 = vmatprep.subr.bf16.mxu1 %v2311_v25 }
 0x3b4   :  { %v544_v52 = vpop.permute.xlu1 %543 }
 0x3b5   :  { %v546_v53 = vadd.f32 %v544_v52, %v2548_v7  ;;  %2053 = vmatmul.mubr.msk.bf16.vlgmr.msra.gmra.mrb[24].mxu1 %vm730_vm3, %v562_v43 }
 0x3b6   :  { %2064 = vmatprep.mubr.msk.bf16.mxu1 %vm2312_vm0, %v2311_v25 }
 0x3b7   :  { %v586_v54 = vpack.c.bf16 %v546_v53, %v546_v53 }
 0x3b9   :  { %590 = vrot.lane.b32.xlu1 %v586_v54, %s2313_s14  ;;  %588 = vrot.lane.b32.xlu0 %v586_v54, %s2314_s15 }
 0x3bd   :  { %592 = vrot.lane.b32.xlu1 %v586_v54, %s2316_s17  ;;  %596 = vrot.lane.b32.xlu0 %v586_v54, %s2318_s19 }
 0x3c1   :  { %594 = vrot.lane.b32.xlu1 %v586_v54, %s2315_s16  ;;  %600 = vrot.lane.b32.xlu0 %v586_v54, %s2319_s20 }
 0x3c5   :  { %598 = vrot.lane.b32.xlu1 %v586_v54, %s2317_s18 }
 0x3c9   :  { %1197 = vrot.lane.b32.xlu1 %v586_v54, %s2320_s2 }
 0x408   :  { %v2621_v55 = vpop.f32.mrb[12].mxu0 }
 0x409   :  { %v2012_v56 = vpop.f32.mrb[13].mxu0  ;;  %v1101_v57 = vsel %vm1100_vm4, %v2621_v55, -inf }
 0x40a   :  { %1102 = vmax.xlane.f32.xlu0 %v1101_v57  ;;  %v775_v58 = vpop.f32.mrb[14].mxu0 }
 0x40b   :  { %v2013_v59 = vpop.f32.mrb[15].mxu0 }
 0x42b   :  { %v591_v60 = vpop.permute.xlu1 %590  ;;  %v589_v34 = vpop.permute.xlu0 %588 }
 0x42f   :  { %v593_v61 = vpop.permute.xlu1 %592  ;;  %v597_v40 = vpop.permute.xlu0 %596 }
 0x433   :  { %v595_v62 = vpop.permute.xlu1 %594  ;;  %v2647_v41 = vpop.permute.xlu0 %600 }
 0x437   :  { %v2625_v63 = vpop.permute.xlu1 %598 }
 0x43b   :  { %v1198_v0 = vpop.permute.xlu1 %1197 }
 0x43c   :  { %v1205_v1 = vsel %vm1203_vm5, %v1198_v0, 0 }
 0x43d   :  { %2057 = vmatpush3.bf16.msra.mxu0 %v1205_v1 }
 0x43e   :  { %2068 = vmatprep.subr.bf16.mxu0 %v2311_v25 }
 0x451   :  { %v818_v2 = vpop.f32.mrb[12].mxu1  ;;  %v864_v3 = vpop.f32.mrb[16].mxu0 }
 0x452   :  { %v2018_v5 = vpop.f32.mrb[13].mxu1  ;;  %v2024_v6 = vpop.f32.mrb[17].mxu0  ;;  %v1104_v7 = vsel %vm1100_vm4, %v818_v2, -inf  ;;  %v1107_v8 = vsel %vm1100_vm4, %v864_v3, -inf }
 0x453   :  { %v821_v9 = vpop.f32.mrb[14].mxu1  ;;  %1105 = vmax.xlane.f32.xlu1 %v1104_v7  ;;  %1108 = vmax.xlane.f32.xlu0 %v1107_v8  ;;  %v867_v10 = vpop.f32.mrb[18].mxu0 }
 0x454   :  { %v2019_v11 = vpop.f32.mrb[15].mxu1  ;;  %v2025_v12 = vpop.f32.mrb[19].mxu0 }
 0x459   :  { %v2631_v13 = vpop.f32.mrb[20].mxu0 }
 0x45a   :  { %v2036_v14 = vpop.f32.mrb[21].mxu0  ;;  %v1113_v24 = vsel %vm1100_vm4, %v2631_v13, -inf }
 0x45b   :  { %v959_v15 = vpop.f32.mrb[22].mxu0 }
 0x45c   :  { %v2037_v16 = vpop.f32.mrb[23].mxu0 }
 0x464   :  { %1295 = vrot.lane.b32.xlu1 %v591_v60, %s2320_s2 }
 0x468   :  { %1343 = vrot.lane.b32.xlu1 %v593_v61, %s2320_s2 }
 0x478   :  { %v910_v17 = vpop.f32.mrb[16].mxu1 }
 0x479   :  { %v2030_v18 = vpop.f32.mrb[17].mxu1  ;;  %v1110_v19 = vsel %vm1100_vm4, %v910_v17, -inf }
 0x47a   :  { %v913_v20 = vpop.f32.mrb[18].mxu1  ;;  %1111 = vmax.xlane.f32.xlu0 %v1110_v19 }
 0x47b   :  { %v2031_v21 = vpop.f32.mrb[19].mxu1 }
 0x47c   :  { %v1048_v22 = vpop.f32.mrb[24].mxu0 }
 0x47d   :  { %v2048_v23 = vpop.f32.mrb[25].mxu0  ;;  %v1119_v33 = vsel %vm1100_vm4, %v1048_v22, -inf }
 0x47e   :  { %1114 = vmax.xlane.f32.xlu0 %v1113_v24  ;;  %v1051_v26 = vpop.f32.mrb[26].mxu0 }
 0x47f   :  { %v2049_v27 = vpop.f32.mrb[27].mxu0 }
 0x480   :  { %v2638_v28 = vpop.f32.mrb[20].mxu1 }
 0x481   :  { %v2042_v29 = vpop.f32.mrb[21].mxu1  ;;  %v1116_v30 = vsel %vm1100_vm4, %v2638_v28, -inf }
 0x482   :  { %1117 = vmax.xlane.f32.xlu0 %v1116_v30  ;;  %v1005_v31 = vpop.f32.mrb[22].mxu1 }
 0x483   :  { %v2043_v32 = vpop.f32.mrb[23].mxu1 }
 0x486   :  { %1120 = vmax.xlane.f32.xlu0 %v1119_v33 }
 0x488   :  { %v2643_v35 = vpop.f32.mrb[24].mxu1 }
 0x489   :  { %v2054_v36 = vpop.f32.mrb[25].mxu1  ;;  %v1122_v37 = vsel %vm1100_vm4, %v2643_v35, -inf }
 0x48a   :  { %1123 = vmax.xlane.f32.xlu0 %v1122_v37  ;;  %v1097_v38 = vpop.f32.mrb[26].mxu1 }
 0x48b   :  { %v2055_v39 = vpop.f32.mrb[27].mxu1 }
 0x497   :  { %v1103_v42 = vpop.xlane.xlu0 %1102 }
 0x498   :  { %v1125_v43 = vsub.f32 %v2621_v55, %v1103_v42 }
 0x49a   :  { %v1133_v44 = vmul.f32 1.442695, %v1125_v43 }
 0x49c   :  { %2150 = vpow2.f32 %v1133_v44 }
 0x4a0   :  { %1247 = vrot.lane.b32.xlu0 %v589_v34, %s2320_s2 }
 0x4a6   :  { %v2151_v45 = vpop.eup %2150 }
 0x4a7   :  { %v1149_v46 = vsel %vm1100_vm4, %v2151_v45, 0.0 }
 0x4a8   :  { %1150 = vadd.xlane.f32.xlu1 %v1149_v46 }
 0x4b9   :  { %1391 = vrot.lane.b32.xlu1 %v595_v62, %s2320_s2 }
 0x4e0   :  { %v1106_v47 = vpop.xlane.xlu1 %1105  ;;  %v1109_v48 = vpop.xlane.xlu0 %1108 }
 0x4e1   :  { %v1126_v49 = vsub.f32 %v818_v2, %v1106_v47  ;;  %v1127_v50 = vsub.f32 %v864_v3, %v1109_v48 }
 0x4e3   :  { %v1135_v51 = vmul.f32 1.442695, %v1126_v49  ;;  %v1137_v52 = vmul.f32 1.442695, %v1127_v50 }
 0x4e4   :  { %v1296_v14 = vpop.permute.xlu1 %1295 }
 0x4e5   :  { %2152 = vpow2.f32 %v1135_v51  ;;  %v1301_v24 = vsel %vm1203_vm5, %v1296_v14, 0 }
 0x4e6   :  { %2154 = vpow2.f32 %v1137_v52 }
 0x4e8   :  { %v1344_v15 = vpop.permute.xlu1 %1343 }
 0x4ef   :  { %v2653_v53 = vpop.eup %2152 }
 0x4f0   :  { %v1152_v54 = vsel %vm1100_vm4, %v2653_v53, 0.0  ;;  %v2657_v55 = vpop.eup %2154 }
 0x4f1   :  { %1153 = vadd.xlane.f32.xlu0 %v1152_v54  ;;  %v1155_v56 = vsel %vm1100_vm4, %v2657_v55, 0.0 }
 0x4f5   :  { %1156 = vadd.xlane.f32.xlu0 %v1155_v56 }
 0x507   :  { %v1112_v57 = vpop.xlane.xlu0 %1111 }
 0x508   :  { %v1128_v58 = vsub.f32 %v910_v17, %v1112_v57 }
 0x50a   :  { %v1139_v59 = vmul.f32 1.442695, %v1128_v58 }
 0x50b   :  { %v1115_v60 = vpop.xlane.xlu0 %1114 }
 0x50c   :  { %2156 = vpow2.f32 %v1139_v59  ;;  %v1129_v61 = vsub.f32 %v2631_v13, %v1115_v60 }
 0x50e   :  { %v1141_v62 = vmul.f32 1.442695, %v1129_v61 }
 0x50f   :  { %v1118_v0 = vpop.xlane.xlu0 %1117 }
 0x510   :  { %2158 = vpow2.f32 %v1141_v62  ;;  %v1130_v17 = vsub.f32 %v2638_v28, %v1118_v0 }
 0x512   :  { %v1143_v18 = vmul.f32 1.442695, %v1130_v17  ;;  %v2321_v17 = vmov 1983009808  }
 0x513   :  { %v1121_v1 = vpop.xlane.xlu0 %1120 }
 0x514   :  { %v1131_v2 = vsub.f32 %v1048_v22, %v1121_v1 }
 0x516   :  { %v2662_v3 = vpop.eup %2156  ;;  %v1145_v5 = vmul.f32 1.442695, %v1131_v2 }
 0x517   :  { %v1124_v6 = vpop.xlane.xlu0 %1123  ;;  %v1158_v7 = vsel %vm1100_vm4, %v2662_v3, 0.0 }
 0x518   :  { %2160 = vpow2.f32 %v1145_v5  ;;  %1159 = vadd.xlane.f32.xlu0 %v1158_v7  ;;  %v1132_v19 = vsub.f32 %v2643_v35, %v1124_v6  ;;  %v1349_v35 = vsel %vm1203_vm5, %v1344_v15, 0 }
 0x51a   :  { %v2666_v8 = vpop.eup %2158  ;;  %v1147_v20 = vmul.f32 1.442695, %v1132_v19 }
 0x51b   :  { %v1248_v9 = vpop.permute.xlu0 %1247  ;;  %v1161_v10 = vsel %vm1100_vm4, %v2666_v8, 0.0 }
 0x51c   :  { %v1253_v11 = vsel %vm1203_vm5, %v1248_v9, 0  ;;  %1162 = vadd.xlane.f32.xlu1 %v1161_v10 }
 0x51d   :  { %2063 = vmatpush3.bf16.msra.mxu1 %v1253_v11 }
 0x51e   :  { %2074 = vmatprep.subr.bf16.mxu1 %v2311_v25 }
 0x522   :  { %v2672_v12 = vpop.eup %2160 }
 0x523   :  { %v1167_v13 = vsel %vm1100_vm4, %v2672_v12, 0.0 }
 0x524   :  { %1168 = vadd.xlane.f32.xlu1 %v1167_v13 }
 0x52e   :  { %1439 = vrot.lane.b32.xlu0 %v597_v40, %s2320_s2 }
 0x535   :  { %v1151_v16 = vpop.xlane.xlu1 %1150  ;;  %1487 = vrot.lane.b32.xlu1 %v2625_v63, %s2320_s2 }
 0x536   :  { %2162 = vrcp.f32 %v1151_v16 }
 0x537   :  { %2164 = vpow2.f32 %v1143_v18  ;;  %v1585_v18 = vunpack.c.l.s4 %v2321_v17 }
 0x538   :  { %2166 = vpow2.f32 %v1147_v20 }
 0x539   :  { %v1392_v37 = vpop.permute.xlu1 %1391  ;;  %v1586_v19 = vunpack.c.0.s8 %v1585_v18 }
 0x53a   :  { %v1397_v39 = vsel %vm1203_vm5, %v1392_v37, 0 }
 0x53b   :  { %v1589_v20 = vsub.s32 %v1586_v19, %v2435_v4 }
 0x540   :  { %v2163_v21 = vpop.eup %2162 }
 0x541   :  { %v1181_v22 = vmul.f32 %v2163_v21, %v2151_v45  ;;  %v2165_v63 = vpop.eup %2164 }
 0x542   :  { %v1164_v26 = vsel %vm1100_vm4, %v2165_v63, 0.0  ;;  %v2687_v27 = vpop.eup %2166 }
 0x543   :  { %v1189_v23 = vpack.c.bf16 %v1181_v22, %v1181_v22  ;;  %v1170_v28 = vsel %vm1100_vm4, %v2687_v27, 0.0 }
 0x545   :  { %2059 = vmatmul.mubr.msk.bf16.vlgmr.msra.gmra.mrb[28].mxu0 %vm1199_vm6, %v1189_v23 }
 0x546   :  { %2069 = vmatpush3.bf16.msra.mxu0 %v1301_v24  ;;  %2070 = vmatprep.mubr.msk.bf16.mxu0 %vm2312_vm0, %v2311_v25 }
 0x547   :  { %2080 = vmatprep.subr.bf16.mxu0 %v2311_v25 }
 0x54d   :  { %1165 = vadd.xlane.f32.xlu0 %v1164_v26 }
 0x551   :  { %1171 = vadd.xlane.f32.xlu0 %v1170_v28 }
 0x567   :  { %1535 = vrot.lane.b32.xlu0 %v2647_v41, %s2320_s2 }
 0x57e   :  { %v1154_v29 = vpop.xlane.xlu0 %1153 }
 0x57f   :  { %2168 = vrcp.f32 %v1154_v29 }
 0x582   :  { %v1157_v30 = vpop.xlane.xlu0 %1156 }
 0x583   :  { %2170 = vrcp.f32 %v1157_v30 }
 0x589   :  { %v2169_v31 = vpop.eup %2168 }
 0x58a   :  { %v1182_v32 = vmul.f32 %v2169_v31, %v2653_v53 }
 0x58c   :  { %v1190_v33 = vpack.c.bf16 %v1182_v32, %v1182_v32 }
 0x58d   :  { %v2171_v34 = vpop.eup %2170 }
 0x58e   :  { %v1183_v36 = vmul.f32 %v2171_v34, %v2657_v55  ;;  %2065 = vmatmul.mubr.msk.bf16.vlgmr.msra.gmra.mrb[28].mxu1 %vm1199_vm6, %v1190_v33 }
 0x58f   :  { %2075 = vmatpush3.bf16.msra.mxu1 %v1349_v35  ;;  %2076 = vmatprep.mubr.msk.bf16.mxu1 %vm2312_vm0, %v2311_v25 }
 0x590   :  { %v1191_v38 = vpack.c.bf16 %v1183_v36, %v1183_v36  ;;  %2086 = vmatprep.subr.bf16.mxu1 %v2311_v25 }
 0x592   :  { %2071 = vmatmul.mubr.msk.bf16.vlgmr.msra.gmra.mrb[32].mxu0 %vm1199_vm6, %v1191_v38 }
 0x593   :  { %2081 = vmatpush3.bf16.msra.mxu0 %v1397_v39  ;;  %2082 = vmatprep.mubr.msk.bf16.mxu0 %vm2312_vm0, %v2311_v25 }
 0x594   :  { %2092 = vmatprep.subr.bf16.mxu0 %v2311_v25 }
 0x5a5   :  { %v1160_v40 = vpop.xlane.xlu0 %1159 }
 0x5a6   :  { %2172 = vrcp.f32 %v1160_v40 }
 0x5a9   :  { %v1163_v41 = vpop.xlane.xlu1 %1162  ;;  %v1440_v45 = vpop.permute.xlu0 %1439 }
 0x5aa   :  { %2174 = vrcp.f32 %v1163_v41  ;;  %v1445_v49 = vsel %vm1203_vm5, %v1440_v45, 0  ;;  %v2322_v41 = vmov 1934713408  }
 0x5b0   :  { %v2173_v42 = vpop.eup %2172 }
 0x5b1   :  { %v1184_v43 = vmul.f32 %v2173_v42, %v2662_v3  ;;  %v1169_v44 = vpop.xlane.xlu1 %1168  ;;  %v1617_v42 = vunpack.c.l.s4 %v2322_v41 }
 0x5b2   :  { %2176 = vrcp.f32 %v1169_v44 }
 0x5b3   :  { %v1192_v46 = vpack.c.bf16 %v1184_v43, %v1184_v43  ;;  %v1618_v44 = vunpack.c.0.s8 %v1617_v42 }
 0x5b4   :  { %v2175_v47 = vpop.eup %2174 }
 0x5b5   :  { %v1185_v48 = vmul.f32 %v2175_v47, %v2666_v8  ;;  %2077 = vmatmul.mubr.msk.bf16.vlgmr.msra.gmra.mrb[32].mxu1 %vm1199_vm6, %v1192_v46  ;;  %v1488_v50 = vpop.permute.xlu1 %1487 }
 0x5b6   :  { %2087 = vmatpush3.bf16.msra.mxu1 %v1445_v49  ;;  %2088 = vmatprep.mubr.msk.bf16.mxu1 %vm2312_vm0, %v2311_v25  ;;  %v1493_v52 = vsel %vm1203_vm5, %v1488_v50, 0  ;;  %v1621_v49 = vsub.s32 %v1618_v44, %v2435_v4 }
 0x5b7   :  { %v1193_v51 = vpack.c.bf16 %v1185_v48, %v1185_v48  ;;  %2098 = vmatprep.subr.bf16.mxu1 %v2311_v25 }
 0x5b9   :  { %2083 = vmatmul.mubr.msk.bf16.vlgmr.msra.gmra.mrb[36].mxu0 %vm1199_vm6, %v1193_v51 }
 0x5ba   :  { %2093 = vmatpush3.bf16.msra.mxu0 %v1493_v52  ;;  %2094 = vmatprep.mubr.msk.bf16.mxu0 %vm2312_vm0, %v2311_v25 }
 0x5bb   :  { %2104 = vmatprep.subr.bf16.mxu0 %v2311_v25 }
 0x5bc   :  { %v2177_v53 = vpop.eup %2176 }
 0x5bd   :  { %v1187_v54 = vmul.f32 %v2177_v53, %v2672_v12 }
 0x5bf   :  { %v1195_v55 = vpack.c.bf16 %v1187_v54, %v1187_v54 }
 0x5c1   :  { %2095 = vmatmul.mubr.msk.bf16.vlgmr.msra.gmra.mrb[40].mxu0 %vm1199_vm6, %v1195_v55 }
 0x5c2   :  { %2108 = vmatprep.mubr.msk.bf16.mxu0 %vm2312_vm0, %v2311_v25 }
 0x5da   :  { %v1166_v56 = vpop.xlane.xlu0 %1165 }
 0x5db   :  { %2178 = vrcp.f32 %v1166_v56 }
 0x5de   :  { %v1172_v57 = vpop.xlane.xlu0 %1171 }
 0x5df   :  { %2180 = vrcp.f32 %v1172_v57 }
 0x5e2   :  { %v1536_v60 = vpop.permute.xlu0 %1535 }
 0x5e3   :  { %v1541_v0 = vsel %vm1203_vm5, %v1536_v60, 0 }
 0x5e5   :  { %v2179_v58 = vpop.eup %2178 }
 0x5e6   :  { %v1186_v59 = vmul.f32 %v2179_v58, %v2165_v63 }
 0x5e8   :  { %v1194_v61 = vpack.c.bf16 %v1186_v59, %v1186_v59 }
 0x5e9   :  { %v2181_v62 = vpop.eup %2180 }
 0x5ea   :  { %2089 = vmatmul.mubr.msk.bf16.vlgmr.msra.gmra.mrb[36].mxu1 %vm1199_vm6, %v1194_v61  ;;  %v1188_v1 = vmul.f32 %v2181_v62, %v2687_v27 }
 0x5eb   :  { %2099 = vmatpush3.bf16.msra.mxu1 %v1541_v0  ;;  %2100 = vmatprep.mubr.msk.bf16.mxu1 %vm2312_vm0, %v2311_v25 }
 0x5ec   :  { %v1196_v2 = vpack.c.bf16 %v1188_v1, %v1188_v1 }
 0x5f2   :  { %2101 = vmatmul.mubr.msk.bf16.vlgmr.msra.gmra.mrb[40].mxu1 %vm1199_vm6, %v1196_v2 }
 0x618   :  { %v1241_v3 = vpop.f32.mrb[28].mxu0 }
 0x619   :  { %v2060_v5 = vpop.f32.mrb[29].mxu0 }
 0x61a   :  { %v1244_v6 = vpop.f32.mrb[30].mxu0 }
 0x61b   :  { %v2061_v7 = vpop.f32.mrb[31].mxu0 }
 0x661   :  { %v1289_v8 = vpop.f32.mrb[28].mxu1 }
 0x662   :  { %v2066_v9 = vpop.f32.mrb[29].mxu1 }
 0x663   :  { %v1292_v10 = vpop.f32.mrb[30].mxu1  ;;  %v2149_v9 = vld [vmem:[#allocation8 + $0x8] sm:$0xff]  }
 0x664   :  { %v2067_v11 = vpop.f32.mrb[31].mxu1 }
 0x665   :  { %v1337_v12 = vpop.f32.mrb[32].mxu0 }
 0x666   :  { %v1583_v13 = vcombine.low %v1241_v3, %v1337_v12  ;;  %v2072_v14 = vpop.f32.mrb[33].mxu0  ;;  %v2148_v3 = vld [vmem:[#allocation8] sm:$0xff]  }
 0x667   :  { %v1340_v15 = vpop.f32.mrb[34].mxu0  ;;  %2105 = vmatpush3.bf16.msra.mxu0 %v2148_v3 }
 0x668   :  { %v2073_v16 = vpop.f32.mrb[35].mxu0  ;;  %v1590_v63 = vrot.slane %v1583_v13, %v1589_v20  ;;  %2106 = vmatprep.subr.bf16.mxu0 %v2311_v25 }
 0x66b   :  { %2107 = vmatpush3.bf16.msra.mxu0 %v2149_v9 }
 0x688   :  { %v1385_v21 = vpop.f32.mrb[32].mxu1 }
 0x689   :  { %v1591_v22 = vcombine.low %v1289_v8, %v1385_v21  ;;  %v2078_v23 = vpop.f32.mrb[33].mxu1 }
 0x68a   :  { %v1388_v24 = vpop.f32.mrb[34].mxu1 }
 0x68b   :  { %v1598_v26 = vrot.slane %v1591_v22, %v1589_v20  ;;  %v2079_v27 = vpop.f32.mrb[35].mxu1 }
 0x68c   :  { %v1433_v28 = vpop.f32.mrb[36].mxu0 }
 0x68d   :  { %v1615_v29 = vcombine.low %v1590_v63, %v1598_v26  ;;  %v2084_v30 = vpop.f32.mrb[37].mxu0 }
 0x68e   :  { %v1436_v31 = vpop.f32.mrb[38].mxu0 }
 0x68f   :  { %v2085_v32 = vpop.f32.mrb[39].mxu0  ;;  %v1622_v54 = vrot.slane %v1615_v29, %v1621_v49  ;;  %v1859_v29 = vld [vmem:[%s2759_s5 + $0x6] ss:$0 sm:$0xff] }
 0x694   :  { %v1529_v33 = vpop.f32.mrb[40].mxu0 }
 0x695   :  { %v1599_v34 = vcombine.low %v1433_v28, %v1529_v33  ;;  %v2096_v35 = vpop.f32.mrb[41].mxu0 }
 0x696   :  { %v1532_v36 = vpop.f32.mrb[42].mxu0 }
 0x697   :  { %v2097_v37 = vpop.f32.mrb[43].mxu0  ;;  %v1606_v50 = vrot.slane %v1599_v34, %v1589_v20 }
 0x6bd   :  { %v1481_v38 = vpop.f32.mrb[36].mxu1 }
 0x6be   :  { %v2090_v39 = vpop.f32.mrb[37].mxu1 }
 0x6bf   :  { %v1484_v40 = vpop.f32.mrb[38].mxu1 }
 0x6c0   :  { %v2091_v43 = vpop.f32.mrb[39].mxu1 }
 0x6c5   :  { %v1577_v45 = vpop.f32.mrb[40].mxu1 }
 0x6c6   :  { %v1607_v46 = vcombine.low %v1481_v38, %v1577_v45  ;;  %v2102_v47 = vpop.f32.mrb[41].mxu1 }
 0x6c7   :  { %v1580_v48 = vpop.f32.mrb[42].mxu1 }
 0x6c8   :  { %v1614_v51 = vrot.slane %v1607_v46, %v1589_v20  ;;  %v2103_v52 = vpop.f32.mrb[43].mxu1 }
 0x6ca   :  { %v1623_v53 = vcombine.low %v1606_v50, %v1614_v51 }
 0x6cc   :  { %v1630_v55 = vrot.slane %v1623_v53, %v1621_v49 }
 0x6ce   :  { %v1631_v56 = vcombine.low %v1622_v54, %v1630_v55  ;;  %v1632_v57 = vcombine.high %v1622_v54, %v1630_v55  ;;  %v1858_v58 = vcombine.high %v1630_v55, %v2311_v25 }
 0x6d0   :  { %v1640_v59 = vrot.slane %v1631_v56, %v1589_v20  ;;  %v1655_v60 = vrot.slane %v1632_v57, %v1589_v20  ;;  %v1633_v61 = vcombine.high %v1631_v56, %v2311_v25  ;;  %v1662_v2 = vrot.slane %v1858_v58, %v1589_v20 }
 0x6d2   :  { %v1664_v62 = vcombine.high %v1640_v59, %v1655_v60  ;;  %v1663_v0 = vcombine.low %v1640_v59, %v1655_v60  ;;  %v1647_v1 = vrot.slane %v1633_v61, %v1589_v20 }
 0x6d4   :  { %v1678_v4 = vrot.slane %v1664_v62, %v1621_v49  ;;  %v1671_v5 = vrot.slane %v1663_v0, %v1621_v49  ;;  %v1679_v6 = vcombine.low %v1647_v1, %v1662_v2  ;;  %v1680_v7 = vcombine.high %v1647_v1, %v1662_v2 }
 0x6d6   :  { %1704 = vrot.lane.b32.xlu0 %v1678_v4, %s2323_s4  ;;  %v1695_v8 = vcombine.high %v1671_v5, %v2311_v25  ;;  %v1687_v10 = vrot.slane %v1679_v6, %v1621_v49  ;;  %v1696_v11 = vcombine.high %v1678_v4, %v2311_v25  ;;  %v1694_v12 = vrot.slane %v1680_v7, %v1621_v49 }
 0x6d8   :  { %1700 = vrot.lane.b32.xlu1 %v1695_v8, %s2302_s8  ;;  %v1697_v13 = vcombine.high %v1687_v10, %v2311_v25  ;;  %v1698_v14 = vcombine.high %v1694_v12, %v2311_v25 }
 0x6da   :  { %1712 = vrot.lane.b32.xlu0 %v1687_v10, %s2324_s7 }
 0x6dc   :  { %1708 = vrot.lane.b32.xlu1 %v1696_v11, %s2325_s1 }
 0x6de   :  { %1720 = vrot.lane.b32.xlu0 %v1694_v12, %s2326_s24 }
 0x6e0   :  { %1716 = vrot.lane.b32.xlu1 %v1697_v13, %s2327_s25 }
 0x6e4   :  { %1724 = vrot.lane.b32.xlu1 %v1698_v14, %s2328_s26 }
 0x748   :  { %v1705_v15 = vpop.permute.xlu0 %1704 }
 0x74a   :  { %v1701_v16 = vpop.permute.xlu1 %1700 }
 0x74b   :  { %v1727_v17 = vsel %vm730_vm3, %v1671_v5, %v1701_v16 }
 0x74c   :  { %v1729_v18 = vsel %vm1728_vm7, %v1727_v17, %v1705_v15  ;;  %v1713_v20 = vpop.permute.xlu0 %1712 }
 0x74e   :  { %v1709_v19 = vpop.permute.xlu1 %1708 }
 0x74f   :  { %v1731_v21 = vsel %vm1730_vm8, %v1729_v18, %v1709_v19 }
 0x750   :  { %v1733_v22 = vsel %vm1732_vm9, %v1731_v21, %v1713_v20  ;;  %v1721_v25 = vpop.permute.xlu0 %1720 }
 0x752   :  { %v1717_v23 = vpop.permute.xlu1 %1716 }
 0x753   :  { %v1735_v24 = vsel %vm1734_vm10, %v1733_v22, %v1717_v23 }
 0x754   :  { %v1737_v63 = vsel %vm1736_vm11, %v1735_v24, %v1721_v25 }
 0x756   :  { %v1725_v26 = vpop.permute.xlu1 %1724 }
 0x757   :  { %v1739_v27 = vsel %vm1738_vm12, %v1737_v63, %v1725_v26 }
 0x758   :  { %v1740_v28 = vpack.c.bf16 %v1739_v27, %v1739_v27 }
 0x75a   :  { %2109 = vmatmul.mubr.msk.bf16.vlgmr.msra.gmra.mrb[44].mxu0 %vm427_vm1, %v1740_v28 }
 0x82d   :  { %v1799_v30 = vpop.f32.mrb[44].mxu0 }
 0x82e   :  { %v1800_v31 = vadd.f32 %v1859_v29, %v1799_v30  ;;  %v2110_v32 = vpop.f32.mrb[45].mxu0 }
 0x82f   :  { %v1802_v33 = vpop.f32.mrb[46].mxu0 }
 0x830   :  { %1805 = vst [vmem:[#allocation10] sm:$0x3] %v1800_v31  ;;  %v2111_v34 = vpop.f32.mrb[47].mxu0 }
 0x831   :  { %2281 = shalt.err (!%p2278_p8)
}
 0x832   :  { %s2282_s5 = scalar_lea.hbm %s2760_s6, 32 }
 0x833   :  { %p2283_p9 = scmp.ne.s32.totalorder %s2760_s6, %s2282_s5  ;;  %p2286_p10 = scmp.lt.u32.totalorder %s2282_s5, %s2760_s6 }
 0x835   :  { %p2288_p11 = pnand %p2286_p10, %p2283_p9 }
 0x837   :  { %2291 = shalt.err (!%p2288_p11)
}
 0x838   :  { %1815 = dma.vmem_to_hbm [thread:$0]  %s1813_s29, 32, %s2760_s6, [#allocation4]  }
 0x839   :  { %2298 = dma.done.wait [#allocation4], 32  }
 0x83a   :  { %2299 = vsyncadd [#allocation4], 4294967264 }
 0x83b   :  { %1819 = vsyncpa [#allocation3], 1 }
 0x83c   :  { %1820 = vsyncpa [#allocation6], 1 }
 0x83d   :  { %1821 = vsyncpa [#allocation9], 1 }
 0x83e   :  { %1822 = vsyncpa [#allocation4], 1 }

</bundles_post_ra>
